<compile_context>
chip_gen: v6e
topology: v6e:2x2x1
jax: 0.10.0
libtpu: 0.0.40
codegen_flags: <defaults>
</compile_context>

<pallas_src>
import jax
import jax.numpy as jnp
from jax.experimental import pallas as pl
from jax.experimental.pallas import tpu as pltpu

BN_EPS = 1e-5


# -----------------------------------------------------------------------------
# Kernels
# -----------------------------------------------------------------------------
def _encoder_kernel(x_ref,
                    w1, t1, w2, t2, w3, t3, w4, t4, w5, t5,
                    enc_ref):
    """PointNet encoder for one batch element, channels-first.

    x_ref block: (1, 3, P) f32 (native NCW).  Each 1x1 conv + folded BN + ReLU
    is h[Cout, P] = relu(W[Cout, Cin] @ h[Cin, P] + t[Cout, 1]) with bf16
    weights/activations and f32 accumulation.  Max-pool over points is a lane
    reduction.  (For very large num_points one would additionally tile P with a
    running-max accumulator; activations here are [<=256, P] bf16.)
    """
    h = x_ref[0].astype(jnp.bfloat16)                       # [3, P] bf16
    layers = ((w1, t1), (w2, t2), (w3, t3), (w4, t4), (w5, t5))
    n_layers = len(layers)
    for idx, (w, t) in enumerate(layers):
        a = jnp.dot(w[...], h, preferred_element_type=jnp.float32) + t[...]
        a = jnp.maximum(a, 0.0)                             # f32 epilogue
        h = a if idx == n_layers - 1 else a.astype(jnp.bfloat16)
    # AdaptiveMaxPool1d(1): max over the points (lane) axis -> [k, 1]
    pooled = jnp.max(h, axis=-1, keepdims=True)             # f32 [k, 1]
    enc_ref[...] = pooled[None].astype(enc_ref.dtype)       # [1, k, 1]


def _decoder_kernel(enc_ref, wd1, td1, wd2, td2, wd3, bd3, rest_ref):
    """Decoder MLP with M = batch, tiled along the 3*num_points output axis.

    The two small hidden layers are recomputed per output tile (cheap relative
    to the wd3 tile matmul) so the tile axis stays fully 'parallel' and wd3 is
    streamed tile-by-tile instead of being resident as one giant block.
    """
    e = enc_ref[...].astype(jnp.bfloat16)                   # [B, k]
    d = jnp.dot(e, wd1[...], preferred_element_type=jnp.float32) + td1[...]
    d = jnp.maximum(d, 0.0).astype(jnp.bfloat16)            # [B, 256]
    d = jnp.dot(d, wd2[...], preferred_element_type=jnp.float32) + td2[...]
    d = jnp.maximum(d, 0.0).astype(jnp.bfloat16)            # [B, 256]
    out = jnp.dot(d, wd3[...], preferred_element_type=jnp.float32) + bd3[...]
    rest_ref[...] = out.astype(rest_ref.dtype)              # [B, tn] lane-dense


# -----------------------------------------------------------------------------
# Parameter preparation (eval-mode BN folding, bf16 weights / f32 biases)
# -----------------------------------------------------------------------------
def fold_conv_bn_cf(w, gamma, beta, rmean, rvar, eps=BN_EPS):
    """Channels-first fold: w [Cout, Cin] -> (bf16 [Cout, Cin], f32 [Cout, 1])."""
    s = gamma / jnp.sqrt(rvar + eps)
    w_fold = w * s[:, None]
    t = (beta - s * rmean)[:, None]
    return w_fold.astype(jnp.bfloat16), t.astype(jnp.float32)


def fold_conv_bn_rm(w, gamma, beta, rmean, rvar, eps=BN_EPS):
    """Row-major fold (batch rows): w [Cout, Cin] -> (bf16 [Cin, Cout], f32 [1, Cout])."""
    s = gamma / jnp.sqrt(rvar + eps)
    w_fold = (w * s[:, None]).T
    t = (beta - s * rmean)[None, :]
    return w_fold.astype(jnp.bfloat16), t.astype(jnp.float32)


def init_params(key, kdim, num_points):
    enc_units = [3, 64, 128, 128, 256, kdim]
    enc_layers = []
    for n, m in zip(enc_units[:-1], enc_units[1:]):
        key, k1, k2, k3, k4, k5 = jax.random.split(key, 6)
        w = jax.random.normal(k1, (m, n), jnp.float32) / jnp.sqrt(float(n))
        gamma = 1.0 + 0.1 * jax.random.normal(k2, (m,), jnp.float32)
        beta = 0.1 * jax.random.normal(k3, (m,), jnp.float32)
        rmean = 0.1 * jax.random.normal(k4, (m,), jnp.float32)
        rvar = jnp.abs(jax.random.normal(k5, (m,), jnp.float32)) + 0.5
        enc_layers.append(fold_conv_bn_cf(w, gamma, beta, rmean, rvar))

    dec_layers = []
    for n, m in ((kdim, 256), (256, 256)):
        key, k1, k2, k3, k4, k5 = jax.random.split(key, 6)
        w = jax.random.normal(k1, (m, n), jnp.float32) / jnp.sqrt(float(n))
        gamma = 1.0 + 0.1 * jax.random.normal(k2, (m,), jnp.float32)
        beta = 0.1 * jax.random.normal(k3, (m,), jnp.float32)
        rmean = 0.1 * jax.random.normal(k4, (m,), jnp.float32)
        rvar = jnp.abs(jax.random.normal(k5, (m,), jnp.float32)) + 0.5
        dec_layers.append(fold_conv_bn_rm(w, gamma, beta, rmean, rvar))

    # Final conv: 256 -> num_points*3, with bias, no BN.
    key, k1, k2 = jax.random.split(key, 3)
    w_last = jax.random.normal(k1, (num_points * 3, 256), jnp.float32) / jnp.sqrt(256.0)
    b_last = 0.1 * jax.random.normal(k2, (num_points * 3,), jnp.float32)
    dec_layers.append((w_last.T.astype(jnp.bfloat16),
                       b_last[None, :].astype(jnp.float32)))
    return enc_layers, dec_layers


# -----------------------------------------------------------------------------
# Wrapper
# -----------------------------------------------------------------------------
def _pick_output_tile(n_total, max_tile=2048):
    """Largest multiple-of-128 divisor of n_total that is <= max_tile."""
    if n_total <= max_tile:
        return n_total
    best = None
    t = 128
    while t <= max_tile:
        if n_total % t == 0:
            best = t
        t += 128
    return best if best is not None else n_total


def autoencoder_pallas(x_ncw, enc_layers, dec_layers, kdim, num_points):
    b, c_in, p = x_ncw.shape
    assert c_in == 3 and p == num_points
    n_total = 3 * num_points

    # ------------------------- encoder: grid over batch ----------------------
    enc_args = []
    enc_in_specs = [pl.BlockSpec((1, 3, p), lambda i: (i, 0, 0))]
    for w, t in enc_layers:
        enc_args += [w, t]
        enc_in_specs += [pl.BlockSpec(w.shape, lambda i: (0, 0)),
                         pl.BlockSpec(t.shape, lambda i: (0, 0))]

    enc_flops = 2 * b * p * sum(int(w.shape[0]) * int(w.shape[1])
                                for w, _ in enc_layers)
    enc_bytes = (int(x_ncw.size) * 4
                 + sum(int(w.size) * 2 + int(t.size) * 4 for w, t in enc_layers)
                 + b * kdim * 4)

    enc3 = pl.pallas_call(
        _encoder_kernel,
        out_shape=jax.ShapeDtypeStruct((b, kdim, 1), jnp.float32),
        grid=(b,),
        in_specs=enc_in_specs,
        out_specs=pl.BlockSpec((1, kdim, 1), lambda i: (i, 0, 0)),
        compiler_params=pltpu.CompilerParams(
            dimension_semantics=("parallel",)),
        cost_estimate=pl.CostEstimate(flops=enc_flops, transcendentals=0,
                                      bytes_accessed=enc_bytes),
    )(x_ncw, *enc_args)

    enc2 = enc3.reshape(b, kdim)                            # [B, k] f32

    # ------------- decoder: M = batch, tiled over the 3*num_points axis ------
    (wd1, td1), (wd2, td2), (wd3, bd3) = dec_layers
    tn = _pick_output_tile(n_total)
    n_tiles = n_total // tn

    dec_flops = (2 * b * (kdim * 256 + 256 * 256) * n_tiles
                 + 2 * b * 256 * n_total)
    dec_bytes = (b * kdim * 4
                 + int(wd1.size) * 2 + int(td1.size) * 4
                 + int(wd2.size) * 2 + int(td2.size) * 4
                 + int(wd3.size) * 2 + int(bd3.size) * 4
                 + b * n_total * 4)

    rest = pl.pallas_call(
        _decoder_kernel,
        out_shape=jax.ShapeDtypeStruct((b, n_total), jnp.float32),
        grid=(n_tiles,),
        in_specs=[pl.BlockSpec((b, kdim), lambda j: (0, 0)),
                  pl.BlockSpec(wd1.shape, lambda j: (0, 0)),
                  pl.BlockSpec(td1.shape, lambda j: (0, 0)),
                  pl.BlockSpec(wd2.shape, lambda j: (0, 0)),
                  pl.BlockSpec(td2.shape, lambda j: (0, 0)),
                  pl.BlockSpec((256, tn), lambda j: (0, j)),
                  pl.BlockSpec((1, tn), lambda j: (0, j))],
        out_specs=pl.BlockSpec((b, tn), lambda j: (0, j)),
        compiler_params=pltpu.CompilerParams(
            dimension_semantics=("parallel",)),
        cost_estimate=pl.CostEstimate(flops=dec_flops, transcendentals=0,
                                      bytes_accessed=dec_bytes),
    )(enc2, wd1, td1, wd2, td2, wd3, bd3)

    encoding = enc3                                         # [b, k, 1], AdaptiveMaxPool1d(1)
    restoration = rest.reshape(b, 3, num_points)            # matches x.view(b, 3, num_points)
    return encoding, restoration


# -----------------------------------------------------------------------------
# Plain-JAX reference (mirrors the same bf16 / f32-accumulation arithmetic)
# -----------------------------------------------------------------------------
def autoencoder_ref(x_ncw, enc_layers, dec_layers):
    b = x_ncw.shape[0]
    h = x_ncw.astype(jnp.bfloat16)                          # [B, 3, P]
    n_layers = len(enc_layers)
    for idx, (w, t) in enumerate(enc_layers):
        a = jnp.einsum('oi,bip->bop', w, h,
                       preferred_element_type=jnp.float32) + t[None]
        a = jnp.maximum(a, 0.0)
        h = a if idx == n_layers - 1 else a.astype(jnp.bfloat16)
    enc = jnp.max(h, axis=-1)                               # [B, k] f32
    d = enc.astype(jnp.bfloat16)
    out = None
    for i, (w, t) in enumerate(dec_layers):
        a = jnp.dot(d, w, preferred_element_type=jnp.float32) + t
        if i < len(dec_layers) - 1:
            d = jnp.maximum(a, 0.0).astype(jnp.bfloat16)
        else:
            out = a
    num_points = out.shape[-1] // 3
    return enc[:, :, None], out.reshape(b, 3, num_points)


if __name__ == "__main__":
    B, KDIM, NUM_POINTS = 2, 32, 128

    key = jax.random.PRNGKey(0)
    key, kx, kp = jax.random.split(key, 3)
    x = jax.random.normal(kx, (B, 3, NUM_POINTS), jnp.float32)  # NCW, as in PyTorch

    enc_layers, dec_layers = init_params(kp, KDIM, NUM_POINTS)

    encoding, restoration = autoencoder_pallas(x, enc_layers, dec_layers,
                                               KDIM, NUM_POINTS)
    jax.block_until_ready((encoding, restoration))

    assert encoding.shape == (B, KDIM, 1)
    assert restoration.shape == (B, 3, NUM_POINTS)

    enc_ref, rest_ref = autoencoder_ref(x, enc_layers, dec_layers)
    assert jnp.allclose(encoding, enc_ref, atol=1e-2, rtol=1e-2)
    assert jnp.allclose(restoration, rest_ref, atol=1e-2, rtol=1e-2)

    print("KERNEL_OK")
</pallas_src>

<mosaic_0001>
module attributes {stable_mosaic.version = 11 : i64} {
  func.func @_encoder_kernel(%arg0: i32, %arg1: memref<1x3x128xf32, #tpu.memory_space<vmem>>, %arg2: memref<64x3xbf16, #tpu.memory_space<vmem>>, %arg3: memref<64x1xf32, #tpu.memory_space<vmem>>, %arg4: memref<128x64xbf16, #tpu.memory_space<vmem>>, %arg5: memref<128x1xf32, #tpu.memory_space<vmem>>, %arg6: memref<128x128xbf16, #tpu.memory_space<vmem>>, %arg7: memref<128x1xf32, #tpu.memory_space<vmem>>, %arg8: memref<256x128xbf16, #tpu.memory_space<vmem>>, %arg9: memref<256x1xf32, #tpu.memory_space<vmem>>, %arg10: memref<32x256xbf16, #tpu.memory_space<vmem>>, %arg11: memref<32x1xf32, #tpu.memory_space<vmem>>, %arg12: memref<1x32x1xf32, #tpu.memory_space<vmem>>) attributes {dimension_semantics = [#tpu.dimension_semantics<parallel>], iteration_bounds = array<i64: 2>, scalar_prefetch = 0 : i64, scratch_operands = 0 : i64, tpu.core_type = #tpu.core_type<tc>, window_params = [{transform_indices = @transform_0, window_bounds = array<i64: 1, 3, 128>}, {pipeline_mode = #tpu.pipeline_mode<synchronous>, transform_indices = @transform_1, window_bounds = array<i64: 64, 3>}, {pipeline_mode = #tpu.pipeline_mode<synchronous>, transform_indices = @transform_2, window_bounds = array<i64: 64, 1>}, {pipeline_mode = #tpu.pipeline_mode<synchronous>, transform_indices = @transform_3, window_bounds = array<i64: 128, 64>}, {pipeline_mode = #tpu.pipeline_mode<synchronous>, transform_indices = @transform_4, window_bounds = array<i64: 128, 1>}, {pipeline_mode = #tpu.pipeline_mode<synchronous>, transform_indices = @transform_5, window_bounds = array<i64: 128, 128>}, {pipeline_mode = #tpu.pipeline_mode<synchronous>, transform_indices = @transform_6, window_bounds = array<i64: 128, 1>}, {pipeline_mode = #tpu.pipeline_mode<synchronous>, transform_indices = @transform_7, window_bounds = array<i64: 256, 128>}, {pipeline_mode = #tpu.pipeline_mode<synchronous>, transform_indices = @transform_8, window_bounds = array<i64: 256, 1>}, {pipeline_mode = #tpu.pipeline_mode<synchronous>, transform_indices = @transform_9, window_bounds = array<i64: 32, 256>}, {pipeline_mode = #tpu.pipeline_mode<synchronous>, transform_indices = @transform_10, window_bounds = array<i64: 32, 1>}, {transform_indices = @transform_11, window_bounds = array<i64: 1, 32, 1>}]} {
    %c0 = arith.constant 0 : index
    %c0_0 = arith.constant 0 : index
    %c0_1 = arith.constant 0 : index
    %0 = vector.load %arg1[%c0, %c0_0, %c0_1] : memref<1x3x128xf32, #tpu.memory_space<vmem>>, vector<1x3x128xf32>
    %1 = vector.shape_cast %0 : vector<1x3x128xf32> to vector<3x128xf32>
    %2 = arith.truncf %1 : vector<3x128xf32> to vector<3x128xbf16>
    %c0_2 = arith.constant 0 : index
    %c0_3 = arith.constant 0 : index
    %3 = vector.load %arg2[%c0_2, %c0_3] : memref<64x3xbf16, #tpu.memory_space<vmem>>, vector<64x3xbf16>
    %cst = arith.constant dense<0.000000e+00> : vector<64x128xf32>
    %4 = tpu.matmul %3, %2, %cst {dimension_numbers = #tpu.dot_dimension_numbers<[1], [0], [0], [1], [0, 0, 1, 1], [], []>} : vector<64x3xbf16>, vector<3x128xbf16>, vector<64x128xf32> -> vector<64x128xf32>
    %c0_4 = arith.constant 0 : index
    %c0_5 = arith.constant 0 : index
    %5 = vector.load %arg3[%c0_4, %c0_5] : memref<64x1xf32, #tpu.memory_space<vmem>>, vector<64x1xf32>
    %6 = vector.broadcast %5 : vector<64x1xf32> to vector<64x128xf32>
    %7 = arith.addf %4, %6 : vector<64x128xf32>
    %cst_6 = arith.constant 0.000000e+00 : f32
    %8 = vector.broadcast %cst_6 : f32 to vector<64x128xf32>
    %9 = arith.maximumf %7, %8 : vector<64x128xf32>
    %10 = arith.truncf %9 : vector<64x128xf32> to vector<64x128xbf16>
    %c0_7 = arith.constant 0 : index
    %c0_8 = arith.constant 0 : index
    %11 = vector.load %arg4[%c0_7, %c0_8] : memref<128x64xbf16, #tpu.memory_space<vmem>>, vector<128x64xbf16>
    %cst_9 = arith.constant dense<0.000000e+00> : vector<128x128xf32>
    %12 = tpu.matmul %11, %10, %cst_9 {dimension_numbers = #tpu.dot_dimension_numbers<[1], [0], [0], [1], [0, 0, 1, 1], [], []>} : vector<128x64xbf16>, vector<64x128xbf16>, vector<128x128xf32> -> vector<128x128xf32>
    %c0_10 = arith.constant 0 : index
    %c0_11 = arith.constant 0 : index
    %13 = vector.load %arg5[%c0_10, %c0_11] : memref<128x1xf32, #tpu.memory_space<vmem>>, vector<128x1xf32>
    %14 = vector.broadcast %13 : vector<128x1xf32> to vector<128x128xf32>
    %15 = arith.addf %12, %14 : vector<128x128xf32>
    %cst_12 = arith.constant 0.000000e+00 : f32
    %16 = vector.broadcast %cst_12 : f32 to vector<128x128xf32>
    %17 = arith.maximumf %15, %16 : vector<128x128xf32>
    %18 = arith.truncf %17 : vector<128x128xf32> to vector<128x128xbf16>
    %c0_13 = arith.constant 0 : index
    %c0_14 = arith.constant 0 : index
    %19 = vector.load %arg6[%c0_13, %c0_14] : memref<128x128xbf16, #tpu.memory_space<vmem>>, vector<128x128xbf16>
    %cst_15 = arith.constant dense<0.000000e+00> : vector<128x128xf32>
    %20 = tpu.matmul %19, %18, %cst_15 {dimension_numbers = #tpu.dot_dimension_numbers<[1], [0], [0], [1], [0, 0, 1, 1], [], []>} : vector<128x128xbf16>, vector<128x128xbf16>, vector<128x128xf32> -> vector<128x128xf32>
    %c0_16 = arith.constant 0 : index
    %c0_17 = arith.constant 0 : index
    %21 = vector.load %arg7[%c0_16, %c0_17] : memref<128x1xf32, #tpu.memory_space<vmem>>, vector<128x1xf32>
    %22 = vector.broadcast %21 : vector<128x1xf32> to vector<128x128xf32>
    %23 = arith.addf %20, %22 : vector<128x128xf32>
    %cst_18 = arith.constant 0.000000e+00 : f32
    %24 = vector.broadcast %cst_18 : f32 to vector<128x128xf32>
    %25 = arith.maximumf %23, %24 : vector<128x128xf32>
    %26 = arith.truncf %25 : vector<128x128xf32> to vector<128x128xbf16>
    %c0_19 = arith.constant 0 : index
    %c0_20 = arith.constant 0 : index
    %27 = vector.load %arg8[%c0_19, %c0_20] : memref<256x128xbf16, #tpu.memory_space<vmem>>, vector<256x128xbf16>
    %cst_21 = arith.constant dense<0.000000e+00> : vector<256x128xf32>
    %28 = tpu.matmul %27, %26, %cst_21 {dimension_numbers = #tpu.dot_dimension_numbers<[1], [0], [0], [1], [0, 0, 1, 1], [], []>} : vector<256x128xbf16>, vector<128x128xbf16>, vector<256x128xf32> -> vector<256x128xf32>
    %c0_22 = arith.constant 0 : index
    %c0_23 = arith.constant 0 : index
    %29 = vector.load %arg9[%c0_22, %c0_23] : memref<256x1xf32, #tpu.memory_space<vmem>>, vector<256x1xf32>
    %30 = vector.broadcast %29 : vector<256x1xf32> to vector<256x128xf32>
    %31 = arith.addf %28, %30 : vector<256x128xf32>
    %cst_24 = arith.constant 0.000000e+00 : f32
    %32 = vector.broadcast %cst_24 : f32 to vector<256x128xf32>
    %33 = arith.maximumf %31, %32 : vector<256x128xf32>
    %34 = arith.truncf %33 : vector<256x128xf32> to vector<256x128xbf16>
    %c0_25 = arith.constant 0 : index
    %c0_26 = arith.constant 0 : index
    %35 = vector.load %arg10[%c0_25, %c0_26] : memref<32x256xbf16, #tpu.memory_space<vmem>>, vector<32x256xbf16>
    %cst_27 = arith.constant dense<0.000000e+00> : vector<32x128xf32>
    %36 = tpu.matmul %35, %34, %cst_27 {dimension_numbers = #tpu.dot_dimension_numbers<[1], [0], [0], [1], [0, 0, 1, 1], [], []>} : vector<32x256xbf16>, vector<256x128xbf16>, vector<32x128xf32> -> vector<32x128xf32>
    %c0_28 = arith.constant 0 : index
    %c0_29 = arith.constant 0 : index
    %37 = vector.load %arg11[%c0_28, %c0_29] : memref<32x1xf32, #tpu.memory_space<vmem>>, vector<32x1xf32>
    %38 = vector.broadcast %37 : vector<32x1xf32> to vector<32x128xf32>
    %39 = arith.addf %36, %38 : vector<32x128xf32>
    %cst_30 = arith.constant 0.000000e+00 : f32
    %40 = vector.broadcast %cst_30 : f32 to vector<32x128xf32>
    %41 = arith.maximumf %39, %40 : vector<32x128xf32>
    %cst_31 = arith.constant dense<0xFF800000> : vector<32xf32>
    %42 = vector.multi_reduction <maximumf>, %41, %cst_31 [1] : vector<32x128xf32> to vector<32xf32>
    %43 = vector.shape_cast %42 : vector<32xf32> to vector<32x1xf32>
    %44 = vector.shape_cast %43 : vector<32x1xf32> to vector<1x32x1xf32>
    %c0_32 = arith.constant 0 : index
    %c0_33 = arith.constant 0 : index
    %c0_34 = arith.constant 0 : index
    %45 = vector.load %arg12[%c0_32, %c0_33, %c0_34] : memref<1x32x1xf32, #tpu.memory_space<vmem>>, vector<1x32x1xf32>
    tpu.vector_store %arg12[%c0_32, %c0_33, %c0_34], %44 {strides = array<i32>} : memref<1x32x1xf32, #tpu.memory_space<vmem>>, vector<1x32x1xf32>,
    return
  }
  func.func @transform_0(%arg0: i32) -> (i32, i32, i32) {
    %c0_i32 = arith.constant 0 : i32
    %c0_i32_0 = arith.constant 0 : i32
    %c0_i32_1 = arith.constant 0 : i32
    return %arg0, %c0_i32, %c0_i32_0 : i32, i32, i32
  }
  func.func @transform_1(%arg0: i32) -> (i32, i32) {
    %c0_i32 = arith.constant 0 : i32
    %c0_i32_0 = arith.constant 0 : i32
    %c0_i32_1 = arith.constant 0 : i32
    return %c0_i32, %c0_i32_0 : i32, i32
  }
  func.func @transform_2(%arg0: i32) -> (i32, i32) {
    %c0_i32 = arith.constant 0 : i32
    %c0_i32_0 = arith.constant 0 : i32
    %c0_i32_1 = arith.constant 0 : i32
    return %c0_i32, %c0_i32_0 : i32, i32
  }
  func.func @transform_3(%arg0: i32) -> (i32, i32) {
    %c0_i32 = arith.constant 0 : i32
    %c0_i32_0 = arith.constant 0 : i32
    %c0_i32_1 = arith.constant 0 : i32
    return %c0_i32, %c0_i32_0 : i32, i32
  }
  func.func @transform_4(%arg0: i32) -> (i32, i32) {
    %c0_i32 = arith.constant 0 : i32
    %c0_i32_0 = arith.constant 0 : i32
    %c0_i32_1 = arith.constant 0 : i32
    return %c0_i32, %c0_i32_0 : i32, i32
  }
  func.func @transform_5(%arg0: i32) -> (i32, i32) {
    %c0_i32 = arith.constant 0 : i32
    %c0_i32_0 = arith.constant 0 : i32
    %c0_i32_1 = arith.constant 0 : i32
    return %c0_i32, %c0_i32_0 : i32, i32
  }
  func.func @transform_6(%arg0: i32) -> (i32, i32) {
    %c0_i32 = arith.constant 0 : i32
    %c0_i32_0 = arith.constant 0 : i32
    %c0_i32_1 = arith.constant 0 : i32
    return %c0_i32, %c0_i32_0 : i32, i32
  }
  func.func @transform_7(%arg0: i32) -> (i32, i32) {
    %c0_i32 = arith.constant 0 : i32
    %c0_i32_0 = arith.constant 0 : i32
    %c0_i32_1 = arith.constant 0 : i32
    return %c0_i32, %c0_i32_0 : i32, i32
  }
  func.func @transform_8(%arg0: i32) -> (i32, i32) {
    %c0_i32 = arith.constant 0 : i32
    %c0_i32_0 = arith.constant 0 : i32
    %c0_i32_1 = arith.constant 0 : i32
    return %c0_i32, %c0_i32_0 : i32, i32
  }
  func.func @transform_9(%arg0: i32) -> (i32, i32) {
    %c0_i32 = arith.constant 0 : i32
    %c0_i32_0 = arith.constant 0 : i32
    %c0_i32_1 = arith.constant 0 : i32
    return %c0_i32, %c0_i32_0 : i32, i32
  }
  func.func @transform_10(%arg0: i32) -> (i32, i32) {
    %c0_i32 = arith.constant 0 : i32
    %c0_i32_0 = arith.constant 0 : i32
    %c0_i32_1 = arith.constant 0 : i32
    return %c0_i32, %c0_i32_0 : i32, i32
  }
  func.func @transform_11(%arg0: i32) -> (i32, i32, i32) {
    %c0_i32 = arith.constant 0 : i32
    %c0_i32_0 = arith.constant 0 : i32
    %c0_i32_1 = arith.constant 0 : i32
    return %arg0, %c0_i32, %c0_i32_0 : i32, i32, i32
  }
}

</mosaic_0001>

<bundles_post_ra>
// kernel: tpu_custom_call.1
= control target key start
LH: loop header
LB: loop body
LE: loop exit
PB: predicated region body
PF: predicated region fallthrough
CT: control target
= control target key end

     0   :  { %s2223_s17 = smov 0   ;;  %s2718_s0 = inlined_call_operand.vmem [shape: f32[2,3,128], index: 0, kind: input, shape index: {}]   ;;  %s2719_s1 = inlined_call_operand.vmem [shape: bf16[64,3], index: 1, kind: input, shape index: {}]   ;;  %s2720_s2 = inlined_call_operand.vmem [shape: f32[64,1], index: 2, kind: input, shape index: {}]   ;;  %s2721_s3 = inlined_call_operand.vmem [shape: bf16[128,64], index: 3, kind: input, shape index: {}]   ;;  %s2722_s4 = inlined_call_operand.vmem [shape: f32[128,1], index: 4, kind: input, shape index: {}]   ;;  %s2723_s5 = inlined_call_operand.vmem [shape: bf16[128,128], index: 5, kind: input, shape index: {}]   ;;  %s2724_s6 = inlined_call_operand.vmem [shape: f32[128,1], index: 6, kind: input, shape index: {}]   ;;  %s2725_s7 = inlined_call_operand.vmem [shape: bf16[256,128], index: 7, kind: input, shape index: {}]   ;;  %s2726_s8 = inlined_call_operand.vmem [shape: f32[256,1], index: 8, kind: input, shape index: {}]   ;;  %s2727_s9 = inlined_call_operand.vmem [shape: bf16[32,256], index: 9, kind: input, shape index: {}]   ;;  %s2728_s10 = inlined_call_operand.vmem [shape: f32[32,1], index: 10, kind: input, shape index: {}]   ;;  %s2729_s11 = inlined_call_operand.vmem [shape: f32[2,32,1], index: 11, kind: output, shape index: {}]  }
   0x1 LB: > { %s1837_s18 = sadd.s32 4294967295, %s2159_s17   ;;  %p1841_p0 = scmp.ge.s32.totalorder %s2159_s17, 1  ;;  %s2159_s17 = sphi %s2223_s17, %s21_s17  }
   0x2   : > { %p336_p1 = scmp.lt.s32.totalorder %s2159_s17, 3 }
   0x4   : > { %p337_p2 = pnand %p1841_p0, %p336_p1 }
   0x5   : > { %p375_p3 = scmp.lt.s32.totalorder (!%p337_p2), %s1837_s18, 1 }
   0x6   : > { %340 = sbr.rel (%p337_p2) target bundleno = 1411 (0x583), region = 64 }
   0xb   : > { %v401_v0 = vld [vmem:[%s2720_s2 + $0x30] sm:$0xff]  ;;  %v399_v1 = vld [vmem:[%s2720_s2 + $0x20] sm:$0xff]  ;;  %vm476_vm0 = vcmask 1040384   ;;  %v2161_v2 = vmov 0   ;;  %v402_v3 = vld [vmem:[%s2720_s2 + $0x38] sm:$0xff]  ;;  %s2731_s18 = smov (!%p375_p3, %s1837_s18), 1 }
   0xc   : > { %2110 = vset.pattern.permute.xlu1 %v2161_v2  ;;  %2109 = vset.pattern.permute.xlu0 %v2161_v2  ;;  %v400_v4 = vld [vmem:[%s2720_s2 + $0x28] sm:$0xff]  ;;  %vm477_vm1 = vcmask 1041408   ;;  %v2162_v5 = vmov 65535   ;;  %vm463_vm2 = vcmask 23552   ;;  %v2111_v7 = vld [vmem:[%s2719_s1] sm:$0xff]   ;;  %s1842_s29 = sshll.u32 %s2731_s18, 2 }
   0xd   : > { %435 = vperm.xlu0 %2109, %v401_v0   ;;  %425 = vperm.xlu1 %2110, %v399_v1   ;;  %v478_v6 = vsel %vm476_vm0, 4294967295, %v2162_v5  ;;  %v398_v8 = vld [vmem:[%s2720_s2 + $0x18] sm:$0xff]  ;;  %s378_s15 = scalar_lea.vmem %s2718_s0, %s1842_s29  ;;  %v397_v11 = vld [vmem:[%s2720_s2 + $0x10] sm:$0xff]  ;;  %v396_v14 = vld [vmem:[%s2720_s2 + $0x8] sm:$0xff]  ;;  %vm712_vm3 = vcmask 523264   ;;  %vm1777_vm4 = vcmask 7168  }
   0xe   : > { %v479_v9 = vsel %vm477_vm1, %v478_v6, 0  ;;  %1987 = vmatprep.mubr.msk.bf16.mxu0 %vm463_vm2, %v2111_v7  ;;  %v385_v10 = vld [vmem:[%s378_s15] sm:$0x7]  ;;  %v2112_v16 = vld [vmem:[%s2719_s1 + $0x8] sm:$0xff]   ;;  %v2113_v17 = vld [vmem:[%s2719_s1 + $0x10] sm:$0xff]   ;;  %s1899_s15 = sshll.u32 %s2731_s18, 5 }
   0xf   : > { %v386_v12 = vpack.c.bf16 %v385_v10, %v385_v10  ;;  %v395_v15 = vld [vmem:[%s2720_s2] sm:$0xff]  ;;  %v591_v18 = vld [vmem:[%s2722_s4 + $0x78] sm:$0xff]  ;;  %v590_v19 = vld [vmem:[%s2722_s4 + $0x70] sm:$0xff]  ;;  %s383_s20 = scalar_lea.vmem %s2729_s11, %s1899_s15 }
  0x10   : > { %v589_v20 = vld [vmem:[%s2722_s4 + $0x68] sm:$0xff]  ;;  %v588_v21 = vld [vmem:[%s2722_s4 + $0x60] sm:$0xff]  ;;  %v2114_v22 = vld [vmem:[%s2719_s1 + $0x18] sm:$0xff]  }
  0x11   : > { %440 = vperm.xlu0 %2109, %v402_v3   ;;  %430 = vperm.xlu1 %2110, %v400_v4   ;;  %v481_v13 = vand.u32 %v479_v9, %v386_v12  ;;  %v587_v23 = vld [vmem:[%s2722_s4 + $0x58] sm:$0xff]  ;;  %v586_v24 = vld [vmem:[%s2722_s4 + $0x50] sm:$0xff]  ;;  %v585_v25 = vld [vmem:[%s2722_s4 + $0x48] sm:$0xff] }
  0x12   : > { %v584_v26 = vld [vmem:[%s2722_s4 + $0x40] sm:$0xff]  ;;  %v583_v27 = vld [vmem:[%s2722_s4 + $0x38] sm:$0xff]  ;;  %v582_v28 = vld [vmem:[%s2722_s4 + $0x30] sm:$0xff] }
  0x13   : > { %1985 = vmatprep.subr.bf16.mxu0 %v481_v13  ;;  %v581_v29 = vld [vmem:[%s2722_s4 + $0x28] sm:$0xff]  ;;  %v580_v30 = vld [vmem:[%s2722_s4 + $0x20] sm:$0xff]  ;;  %v579_v31 = vld [vmem:[%s2722_s4 + $0x18] sm:$0xff] }
  0x14   : > { %1986 = vmatpush3.bf16.msra.mxu0 %v481_v13  ;;  %v578_v32 = vld [vmem:[%s2722_s4 + $0x10] sm:$0xff]  ;;  %v577_v33 = vld [vmem:[%s2722_s4 + $0x8] sm:$0xff]  ;;  %v576_v34 = vld [vmem:[%s2722_s4] sm:$0xff] }
  0x15   : > { %420 = vperm.xlu1 %2110, %v398_v8   ;;  %415 = vperm.xlu0 %2109, %v397_v11   ;;  %v889_v35 = vld [vmem:[%s2724_s6 + $0x78] sm:$0xff]  ;;  %v888_v36 = vld [vmem:[%s2724_s6 + $0x70] sm:$0xff]  ;;  %v887_v37 = vld [vmem:[%s2724_s6 + $0x68] sm:$0xff] }
  0x16   : > { %v886_v38 = vld [vmem:[%s2724_s6 + $0x60] sm:$0xff]  ;;  %v885_v39 = vld [vmem:[%s2724_s6 + $0x58] sm:$0xff]  ;;  %v884_v40 = vld [vmem:[%s2724_s6 + $0x50] sm:$0xff] }
  0x17   : > { %1988 = vmatmul.mubr.msk.bf16.vlgmr.msra.gmra.mxu0 %vm463_vm2, %v2112_v16  ;;  %v883_v41 = vld [vmem:[%s2724_s6 + $0x48] sm:$0xff]  ;;  %v882_v42 = vld [vmem:[%s2724_s6 + $0x40] sm:$0xff]  ;;  %v881_v43 = vld [vmem:[%s2724_s6 + $0x38] sm:$0xff] }
  0x18   : > { %1991 = vmatprep.mubr.msk.bf16.mxu0 %vm463_vm2, %v2113_v17  ;;  %v880_v44 = vld [vmem:[%s2724_s6 + $0x30] sm:$0xff]  ;;  %v879_v45 = vld [vmem:[%s2724_s6 + $0x28] sm:$0xff]  ;;  %v878_v46 = vld [vmem:[%s2724_s6 + $0x20] sm:$0xff] }
  0x19   : > { %410 = vperm.xlu1 %2110, %v396_v14   ;;  %405 = vperm.xlu0 %2109, %v395_v15   ;;  %v877_v47 = vld [vmem:[%s2724_s6 + $0x18] sm:$0xff]  ;;  %v876_v48 = vld [vmem:[%s2724_s6 + $0x10] sm:$0xff]  ;;  %v875_v49 = vld [vmem:[%s2724_s6 + $0x8] sm:$0xff] }
  0x1a   : > { %v874_v50 = vld [vmem:[%s2724_s6] sm:$0xff]  ;;  %v1202_v51 = vld [vmem:[%s2726_s8 + $0xf8] sm:$0xff]  ;;  %v1201_v52 = vld [vmem:[%s2726_s8 + $0xf0] sm:$0xff] }
  0x1b   : > { %v1186_v53 = vld [vmem:[%s2726_s8 + $0x78] sm:$0xff]  ;;  %v1185_v54 = vld [vmem:[%s2726_s8 + $0x70] sm:$0xff]  ;;  %v1200_v55 = vld [vmem:[%s2726_s8 + $0xe8] sm:$0xff] }
  0x1c   : > { %v1199_v56 = vld [vmem:[%s2726_s8 + $0xe0] sm:$0xff]  ;;  %v1184_v57 = vld [vmem:[%s2726_s8 + $0x68] sm:$0xff]  ;;  %v1198_v59 = vld [vmem:[%s2726_s8 + $0xd8] sm:$0xff] }
  0x1d   : > { %669 = vperm.xlu1 %2110, %v591_v18   ;;  %664 = vperm.xlu0 %2109, %v590_v19   ;;  %v1183_v58 = vld [vmem:[%s2726_s8 + $0x60] sm:$0xff]  ;;  %v1197_v60 = vld [vmem:[%s2726_s8 + $0xd0] sm:$0xff]  ;;  %v1182_v61 = vld [vmem:[%s2726_s8 + $0x58] sm:$0xff] }
  0x1e   : > { %v1181_v62 = vld [vmem:[%s2726_s8 + $0x50] sm:$0xff]  ;;  %v1196_v63 = vld [vmem:[%s2726_s8 + $0xc8] sm:$0xff]  ;;  %v1195_v0 = vld [vmem:[%s2726_s8 + $0xc0] sm:$0xff] }
  0x1f   : > { %1992 = vmatmul.mubr.msk.bf16.gmra.mxu0 %vm463_vm2, %v2114_v22  ;;  %v1180_v1 = vld [vmem:[%s2726_s8 + $0x48] sm:$0xff]  ;;  %v1179_v2 = vld [vmem:[%s2726_s8 + $0x40] sm:$0xff]  ;;  %v1194_v3 = vld [vmem:[%s2726_s8 + $0xb8] sm:$0xff] }
  0x20   : > { %v1193_v4 = vld [vmem:[%s2726_s8 + $0xb0] sm:$0xff]  ;;  %v2115_v5 = vld [vmem:[%s2721_s3] sm:$0xff]   ;;  %v1178_v6 = vld [vmem:[%s2726_s8 + $0x38] sm:$0xff] }
  0x21   : > { %659 = vperm.xlu1 %2110, %v589_v20   ;;  %654 = vperm.xlu0 %2109, %v588_v21   ;;  %v1177_v7 = vld [vmem:[%s2726_s8 + $0x30] sm:$0xff]  ;;  %v1192_v8 = vld [vmem:[%s2726_s8 + $0xa8] sm:$0xff]  ;;  %v1191_v9 = vld [vmem:[%s2726_s8 + $0xa0] sm:$0xff] }
  0x22   : > { %2003 = vmatprep.mubr.msk.bf16.mxu0 %vm712_vm3, %v2115_v5  ;;  %v1176_v10 = vld [vmem:[%s2726_s8 + $0x28] sm:$0xff]  ;;  %v1175_v11 = vld [vmem:[%s2726_s8 + $0x20] sm:$0xff]  ;;  %v1190_v12 = vld [vmem:[%s2726_s8 + $0x98] sm:$0xff] }
  0x23   : > { %v1189_v13 = vld [vmem:[%s2726_s8 + $0x90] sm:$0xff]  ;;  %v1174_v14 = vld [vmem:[%s2726_s8 + $0x18] sm:$0xff]  ;;  %v1188_v16 = vld [vmem:[%s2726_s8 + $0x88] sm:$0xff] }
  0x24   : > { %v1173_v15 = vld [vmem:[%s2726_s8 + $0x10] sm:$0xff]  ;;  %v1187_v17 = vld [vmem:[%s2726_s8 + $0x80] sm:$0xff]  ;;  %v1172_v18 = vld [vmem:[%s2726_s8 + $0x8] sm:$0xff] }
  0x25   : > { %649 = vperm.xlu1 %2110, %v587_v23   ;;  %644 = vperm.xlu0 %2109, %v586_v24   ;;  %v1171_v19 = vld [vmem:[%s2726_s8] sm:$0xff]  ;;  %v1673_v20 = vld [vmem:[%s2728_s10 + $0x8] sm:$0xff]  ;;  %v1675_v22 = vld [vmem:[%s2728_s10 + $0x18] sm:$0xff] }
  0x26   : > { %v1672_v21 = vld [vmem:[%s2728_s10] sm:$0xff]  ;;  %v1674_v23 = vld [vmem:[%s2728_s10 + $0x10] sm:$0xff] }
  0x29   : > { %639 = vperm.xlu1 %2110, %v585_v25   ;;  %634 = vperm.xlu0 %2109, %v584_v26  }
  0x2d   : > { %629 = vperm.xlu1 %2110, %v583_v27   ;;  %624 = vperm.xlu0 %2109, %v582_v28  }
  0x31   : > { %619 = vperm.xlu1 %2110, %v581_v29   ;;  %614 = vperm.xlu0 %2109, %v580_v30  }
  0x35   : > { %609 = vperm.xlu1 %2110, %v579_v31   ;;  %604 = vperm.xlu0 %2109, %v578_v32  }
  0x39   : > { %599 = vperm.xlu1 %2110, %v577_v33   ;;  %594 = vperm.xlu0 %2109, %v576_v34  }
  0x3d   : > { %967 = vperm.xlu1 %2110, %v889_v35   ;;  %962 = vperm.xlu0 %2109, %v888_v36  }
  0x41   : > { %957 = vperm.xlu1 %2110, %v887_v37   ;;  %952 = vperm.xlu0 %2109, %v886_v38  }
  0x45   : > { %947 = vperm.xlu1 %2110, %v885_v39   ;;  %942 = vperm.xlu0 %2109, %v884_v40  }
  0x49   : > { %937 = vperm.xlu1 %2110, %v883_v41   ;;  %932 = vperm.xlu0 %2109, %v882_v42  }
  0x4d   : > { %927 = vperm.xlu1 %2110, %v881_v43   ;;  %922 = vperm.xlu0 %2109, %v880_v44  }
  0x51   : > { %917 = vperm.xlu1 %2110, %v879_v45   ;;  %912 = vperm.xlu0 %2109, %v878_v46  }
  0x55   : > { %907 = vperm.xlu1 %2110, %v877_v47   ;;  %902 = vperm.xlu0 %2109, %v876_v48  }
  0x59   : > { %897 = vperm.xlu1 %2110, %v875_v49   ;;  %892 = vperm.xlu0 %2109, %v874_v50  }
  0x5d   : > { %1360 = vperm.xlu1 %2110, %v1202_v51   ;;  %1355 = vperm.xlu0 %2109, %v1201_v52  }
  0x61   : > { %1280 = vperm.xlu1 %2110, %v1186_v53   ;;  %1275 = vperm.xlu0 %2109, %v1185_v54  }
  0x65   : > { %1350 = vperm.xlu1 %2110, %v1200_v55   ;;  %1345 = vperm.xlu0 %2109, %v1199_v56  }
  0x69   : > { %1270 = vperm.xlu1 %2110, %v1184_v57   ;;  %1265 = vperm.xlu0 %2109, %v1183_v58  }
  0x6d   : > { %1340 = vperm.xlu1 %2110, %v1198_v59   ;;  %1335 = vperm.xlu0 %2109, %v1197_v60   ;;  %v2116_v60 = vld [vmem:[%s2721_s3 + $0x8] sm:$0xff]  }
  0x71   : > { %1260 = vperm.xlu1 %2110, %v1182_v61   ;;  %1255 = vperm.xlu0 %2109, %v1181_v62   ;;  %v2117_v61 = vld [vmem:[%s2721_s3 + $0x10] sm:$0xff]   ;;  %v2118_v62 = vld [vmem:[%s2721_s3 + $0x18] sm:$0xff]  }
  0x75   : > { %1330 = vperm.xlu1 %2110, %v1196_v63   ;;  %1325 = vperm.xlu0 %2109, %v1195_v0   ;;  %v2119_v63 = vld [vmem:[%s2721_s3 + $0x20] sm:$0xff]   ;;  %v2120_v0 = vld [vmem:[%s2721_s3 + $0x28] sm:$0xff]  }
  0x79   : > { %1250 = vperm.xlu1 %2110, %v1180_v1   ;;  %1245 = vperm.xlu0 %2109, %v1179_v2   ;;  %v2121_v1 = vld [vmem:[%s2721_s3 + $0x30] sm:$0xff]   ;;  %v2122_v2 = vld [vmem:[%s2721_s3 + $0x38] sm:$0xff]  }
  0x7d   : > { %1320 = vperm.xlu1 %2110, %v1194_v3   ;;  %1315 = vperm.xlu0 %2109, %v1193_v4   ;;  %v2123_v3 = vld [vmem:[%s2723_s5] sm:$0xff]  }
  0x81   : > { %1240 = vperm.xlu1 %2110, %v1178_v6   ;;  %1235 = vperm.xlu0 %2109, %v1177_v7  }
  0x85   : > { %1310 = vperm.xlu1 %2110, %v1192_v8   ;;  %1305 = vperm.xlu0 %2109, %v1191_v9  }
  0x88   : > { %v426_v25 = vpop.permute.xlu1 %425  ;;  %v436_v26 = vpop.permute.xlu0 %435 }
  0x89   : > { %1230 = vperm.xlu1 %2110, %v1176_v10   ;;  %1225 = vperm.xlu0 %2109, %v1175_v11  }
  0x8c   : > { %v431_v29 = vpop.permute.xlu1 %430  ;;  %v441_v31 = vpop.permute.xlu0 %440 }
  0x8d   : > { %1300 = vperm.xlu1 %2110, %v1190_v12   ;;  %1295 = vperm.xlu0 %2109, %v1189_v13  }
  0x90   : > { %v421_v35 = vpop.permute.xlu1 %420  ;;  %v416_v39 = vpop.permute.xlu0 %415 }
  0x91   : > { %1220 = vperm.xlu1 %2110, %v1174_v14   ;;  %1215 = vperm.xlu0 %2109, %v1173_v15  }
  0x94   : > { %v411_v49 = vpop.permute.xlu1 %410  ;;  %v406_v53 = vpop.permute.xlu0 %405 }
  0x95   : > { %1290 = vperm.xlu1 %2110, %v1188_v16   ;;  %1285 = vperm.xlu0 %2109, %v1187_v17  }
  0x98   : > { %v670_v8 = vpop.permute.xlu1 %669  ;;  %v665_v10 = vpop.permute.xlu0 %664 }
  0x99   : > { %1210 = vperm.xlu1 %2110, %v1172_v18   ;;  %1205 = vperm.xlu0 %2109, %v1171_v19  }
  0x9c   : > { %v660_v13 = vpop.permute.xlu1 %659  ;;  %v655_v15 = vpop.permute.xlu0 %654 }
  0x9d   : > { %1683 = vperm.xlu1 %2110, %v1673_v20   ;;  %1678 = vperm.xlu0 %2109, %v1672_v21  }
  0xa0   : > { %v650_v18 = vpop.permute.xlu1 %649  ;;  %v645_v20 = vpop.permute.xlu0 %644 }
  0xa1   : > { %1693 = vperm.xlu1 %2110, %v1675_v22   ;;  %1688 = vperm.xlu0 %2109, %v1674_v23  }
  0xa4   : > { %v640_v23 = vpop.permute.xlu1 %639 }
  0xd7   : > { %v1989_v24 = vpop.f32.mrf.mxu0 }
  0xd8   : > { %v526_v45 = vadd.f32 %v1989_v24, %v416_v39 }
  0xd9   : > { %v517_v27 = vpop.f32.mrf.mxu0 }
  0xda   : > { %v550_v54 = vmax.f32 %v526_v45, 0.0  ;;  %v518_v55 = vadd.f32 %v517_v27, %v406_v53 }
  0xdb   : > { %v1990_v28 = vpop.f32.mrf.mxu0 }
  0xdc   : > { %v529_v41 = vadd.f32 %v1990_v28, %v421_v35  ;;  %v548_v58 = vmax.f32 %v518_v55, 0.0  ;;  %v630_v35 = vpop.permute.xlu1 %629 }
  0xdd   : > { %v520_v30 = vpop.f32.mrf.mxu0 }
  0xde   : > { %v551_v50 = vmax.f32 %v529_v41, 0.0  ;;  %v521_v51 = vadd.f32 %v520_v30, %v411_v49 }
  0xdf   : > { %v1993_v32 = vpop.f32.mrf.mxu0 }
  0xe0   : > { %v542_v34 = vadd.f32 %v1993_v32, %v436_v26  ;;  %v557_v56 = vpack.c.bf16 %v551_v50, %v550_v54  ;;  %v549_v57 = vmax.f32 %v521_v51, 0.0  ;;  %v635_v26 = vpop.permute.xlu0 %634 }
  0xe1   : > { %v533_v33 = vpop.f32.mrf.mxu0 }
  0xe2   : > { %v534_v37 = vadd.f32 %v533_v33, %v426_v25  ;;  %v554_v42 = vmax.f32 %v542_v34, 0.0  ;;  %v556_v59 = vpack.c.bf16 %v549_v57, %v548_v58 }
  0xe3   : > { %v1994_v36 = vpop.f32.mrf.mxu0 }
  0xe4   : > { %v545_v38 = vadd.f32 %v1994_v36, %v441_v31  ;;  %v552_v46 = vmax.f32 %v534_v37, 0.0 }
  0xe5   : > { %v536_v40 = vpop.f32.mrf.mxu0 }
  0xe6   : > { %v555_v43 = vmax.f32 %v545_v38, 0.0  ;;  %v537_v44 = vadd.f32 %v536_v40, %v431_v29  ;;  %v625_v40 = vpop.permute.xlu0 %624 }
  0xe8   : > { %v559_v47 = vpack.c.bf16 %v555_v43, %v554_v42  ;;  %v553_v48 = vmax.f32 %v537_v44, 0.0 }
  0xea   : > { %v558_v52 = vpack.c.bf16 %v553_v48, %v552_v46  ;;  %1995 = vmatprep.subr.bf16.mxu0 %v559_v47  ;;  %v620_v46 = vpop.permute.xlu1 %619  ;;  %v615_v50 = vpop.permute.xlu0 %614 }
  0xeb   : > { %1996 = vmatpush3.bf16.msra.mxu0 %v559_v47 }
  0xec   : > { %1997 = vmatprep.subr.bf16.mxu0 %v558_v52 }
  0xef   : > { %1998 = vmatpush3.bf16.msra.mxu0 %v558_v52 }
  0xf0   : > { %1999 = vmatprep.subr.bf16.mxu0 %v557_v56 }
  0xf3   : > { %2000 = vmatpush3.bf16.msra.mxu0 %v557_v56  ;;  %v610_v56 = vpop.permute.xlu1 %609 }
  0xf4   : > { %2001 = vmatprep.subr.bf16.mxu0 %v556_v59 }
  0xf7   : > { %2002 = vmatpush3.bf16.msra.mxu0 %v556_v59  ;;  %v605_v59 = vpop.permute.xlu0 %604 }
  0xfa   : > { %2004 = vmatmul.mubr.msk.bf16.vlgmr.msra.gmra.mxu0 %vm712_vm3, %v2116_v60 }
  0xfb   : > { %2007 = vmatprep.mubr.msk.bf16.mxu0 %vm712_vm3, %v2117_v61 }
 0x102   : > { %2008 = vmatmul.mubr.msk.bf16.gmra.mxu0 %vm712_vm3, %v2118_v62 }
 0x103   : > { %2011 = vmatprep.mubr.msk.bf16.mxu0 %vm712_vm3, %v2119_v63 }
 0x10a   : > { %2012 = vmatmul.mubr.msk.bf16.gmra.mxu0 %vm712_vm3, %v2120_v0 }
 0x10b   : > { %2015 = vmatprep.mubr.msk.bf16.mxu0 %vm712_vm3, %v2121_v1  ;;  %v600_v1 = vpop.permute.xlu1 %599 }
 0x112   : > { %2016 = vmatmul.mubr.msk.bf16.gmra.mxu0 %vm712_vm3, %v2122_v2 }
 0x113   : > { %2035 = vmatprep.mubr.bf16.mxu0 %v2123_v3 }
 0x1ba   : > { %v2516_v4 = vpop.f32.mrf.mxu0 }
 0x1bb   : > { %v780_v63 = vadd.f32 %v2516_v4, %v605_v59  ;;  %v2124_v4 = vld [vmem:[%s2723_s5 + $0x8] sm:$0xff]  }
 0x1bc   : > { %v2518_v5 = vpop.f32.mrf.mxu0 }
 0x1be   : > { %v2006_v6 = vpop.f32.mrf.mxu0 }
 0x1bf   : > { %v783_v60 = vadd.f32 %v2006_v6, %v610_v56 }
 0x1c0   : > { %v2520_v7 = vpop.f32.mrf.mxu0 }
 0x1c1   : > { %v837_v2 = vmax.f32 %v783_v60, 0.0  ;;  %v775_v3 = vadd.f32 %v2520_v7, %v600_v1  ;;  %v2125_v7 = vld [vmem:[%s2723_s5 + $0x10] sm:$0xff]  }
 0x1c2   : > { %v2009_v9 = vpop.f32.mrf.mxu0 }
 0x1c3   : > { %v796_v51 = vadd.f32 %v2009_v9, %v625_v40  ;;  %v595_v9 = vpop.permute.xlu0 %594  ;;  %v835_v6 = vmax.f32 %v775_v3, 0.0 }
 0x1c4   : > { %v787_v11 = vpop.f32.mrf.mxu0 }
 0x1c5   : > { %v840_v57 = vmax.f32 %v796_v51, 0.0  ;;  %v788_v58 = vadd.f32 %v787_v11, %v615_v50  ;;  %v772_v11 = vadd.f32 %v2518_v5, %v595_v9  ;;  %v2126_v5 = vld [vmem:[%s2723_s5 + $0x18] sm:$0xff]  }
 0x1c6   : > { %v2010_v12 = vpop.f32.mrf.mxu0 }
 0x1c7   : > { %v799_v47 = vadd.f32 %v2010_v12, %v630_v35  ;;  %v838_v0 = vmax.f32 %v788_v58, 0.0 }
 0x1c8   : > { %v790_v14 = vpop.f32.mrf.mxu0 }
 0x1c9   : > { %v841_v53 = vmax.f32 %v799_v47, 0.0  ;;  %v791_v54 = vadd.f32 %v790_v14, %v620_v46 }
 0x1ca   : > { %v2013_v16 = vpop.f32.mrf.mxu0 }
 0x1cb   : > { %v812_v36 = vadd.f32 %v2013_v16, %v645_v20  ;;  %v853_v61 = vpack.c.bf16 %v841_v53, %v840_v57  ;;  %v839_v62 = vmax.f32 %v791_v54, 0.0  ;;  %v2128_v16 = vld [vmem:[%s2723_s5 + $0x28] sm:$0xff]  }
 0x1cc   : > { %v803_v17 = vpop.f32.mrf.mxu0 }
 0x1cd   : > { %v844_v44 = vmax.f32 %v812_v36, 0.0  ;;  %v804_v45 = vadd.f32 %v803_v17, %v635_v26  ;;  %v2129_v17 = vld [vmem:[%s2723_s5 + $0x30] sm:$0xff]   ;;  %v963_v26 = vpop.permute.xlu0 %962 }
 0x1ce   : > { %v2014_v19 = vpop.f32.mrf.mxu0 }
 0x1cf   : > { %v815_v31 = vadd.f32 %v2014_v19, %v650_v18  ;;  %v842_v52 = vmax.f32 %v804_v45, 0.0  ;;  %v2130_v18 = vld [vmem:[%s2723_s5 + $0x38] sm:$0xff]   ;;  %v2131_v19 = vld [vmem:[%s2725_s7] sm:$0xff]  }
 0x1d0   : > { %v806_v21 = vpop.f32.mrf.mxu0  ;;  %2067 = vmatprep.mubr.bf16.mxu1 %v2131_v19 }
 0x1d1   : > { %v845_v41 = vmax.f32 %v815_v31, 0.0  ;;  %v807_v42 = vadd.f32 %v806_v21, %v640_v23  ;;  %v953_v31 = vpop.permute.xlu0 %952 }
 0x1d2   : > { %v2017_v22 = vpop.f32.mrf.mxu0 }
 0x1d3   : > { %v828_v25 = vadd.f32 %v2017_v22, %v665_v10  ;;  %v855_v48 = vpack.c.bf16 %v845_v41, %v844_v44  ;;  %v843_v49 = vmax.f32 %v807_v42, 0.0  ;;  %v836_v10 = vmax.f32 %v780_v63, 0.0 }
 0x1d4   : > { %v819_v24 = vpop.f32.mrf.mxu0 }
 0x1d5   : > { %v820_v28 = vadd.f32 %v819_v24, %v655_v15  ;;  %v848_v32 = vmax.f32 %v828_v25, 0.0  ;;  %v854_v55 = vpack.c.bf16 %v843_v49, %v842_v52  ;;  %v851_v12 = vpack.c.bf16 %v837_v2, %v836_v10  ;;  %v2127_v15 = vld [vmem:[%s2723_s5 + $0x20] sm:$0xff]   ;;  %v968_v24 = vpop.permute.xlu1 %967  ;;  %v943_v36 = vpop.permute.xlu0 %942 }
 0x1d6   : > { %v2018_v27 = vpop.f32.mrf.mxu0 }
 0x1d7   : > { %v831_v29 = vadd.f32 %v2018_v27, %v670_v8  ;;  %v846_v37 = vmax.f32 %v820_v28, 0.0  ;;  %v852_v8 = vpack.c.bf16 %v839_v62, %v838_v0 }
 0x1d8   : > { %v822_v30 = vpop.f32.mrf.mxu0 }
 0x1d9   : > { %v849_v33 = vmax.f32 %v831_v29, 0.0  ;;  %v823_v34 = vadd.f32 %v822_v30, %v660_v13  ;;  %v834_v13 = vmax.f32 %v772_v11, 0.0  ;;  %v958_v29 = vpop.permute.xlu1 %957  ;;  %v933_v42 = vpop.permute.xlu0 %932 }
 0x1db   : > { %v857_v38 = vpack.c.bf16 %v849_v33, %v848_v32  ;;  %v847_v39 = vmax.f32 %v823_v34, 0.0  ;;  %v850_v14 = vpack.c.bf16 %v835_v6, %v834_v13 }
 0x1dd   : > { %v856_v43 = vpack.c.bf16 %v847_v39, %v846_v37  ;;  %2019 = vmatprep.subr.bf16.mxu0 %v857_v38  ;;  %v948_v34 = vpop.permute.xlu1 %947  ;;  %v923_v56 = vpop.permute.xlu0 %922 }
 0x1de   : > { %2020 = vmatpush3.bf16.msra.mxu0 %v857_v38 }
 0x1df   : > { %2021 = vmatprep.subr.bf16.mxu0 %v856_v43 }
 0x1e1   : > { %v938_v39 = vpop.permute.xlu1 %937  ;;  %v913_v2 = vpop.permute.xlu0 %912 }
 0x1e2   : > { %2022 = vmatpush3.bf16.msra.mxu0 %v856_v43 }
 0x1e3   : > { %2023 = vmatprep.subr.bf16.mxu0 %v855_v48 }
 0x1e5   : > { %v928_v51 = vpop.permute.xlu1 %927 }
 0x1e6   : > { %2024 = vmatpush3.bf16.msra.mxu0 %v855_v48 }
 0x1e7   : > { %2025 = vmatprep.subr.bf16.mxu0 %v854_v55 }
 0x1e9   : > { %v918_v62 = vpop.permute.xlu1 %917 }
 0x1ea   : > { %2026 = vmatpush3.bf16.msra.mxu0 %v854_v55 }
 0x1eb   : > { %2027 = vmatprep.subr.bf16.mxu0 %v853_v61 }
 0x1ee   : > { %2028 = vmatpush3.bf16.msra.mxu0 %v853_v61 }
 0x1ef   : > { %2029 = vmatprep.subr.bf16.mxu0 %v852_v8 }
 0x1f2   : > { %2030 = vmatpush3.bf16.msra.mxu0 %v852_v8 }
 0x1f3   : > { %2031 = vmatprep.subr.bf16.mxu0 %v851_v12 }
 0x1f6   : > { %2032 = vmatpush3.bf16.msra.mxu0 %v851_v12  ;;  %v908_v12 = vpop.permute.xlu1 %907 }
 0x1f7   : > { %2033 = vmatprep.subr.bf16.mxu0 %v850_v14 }
 0x1fa   : > { %2034 = vmatpush3.bf16.msra.mxu0 %v850_v14  ;;  %v903_v14 = vpop.permute.xlu0 %902 }
 0x1fd   : > { %2036 = vmatmul.mubr.bf16.vlgmr.msra.gmra.mxu0 %v2124_v4 }
 0x1fe   : > { %2039 = vmatprep.mubr.bf16.mxu0 %v2125_v7 }
 0x205   : > { %2040 = vmatmul.mubr.bf16.gmra.mxu0 %v2126_v5 }
 0x206   : > { %2043 = vmatprep.mubr.bf16.mxu0 %v2127_v15 }
 0x20d   : > { %2044 = vmatmul.mubr.bf16.gmra.mxu0 %v2128_v16 }
 0x20e   : > { %2047 = vmatprep.mubr.bf16.mxu0 %v2129_v17  ;;  %v898_v17 = vpop.permute.xlu1 %897 }
 0x215   : > { %2048 = vmatmul.mubr.bf16.gmra.mxu0 %v2130_v18 }
 0x2bd   : > { %v2549_v20 = vpop.f32.mrf.mxu0 }
 0x2be   : > { %v1061_v15 = vadd.f32 %v2549_v20, %v903_v14  ;;  %v2132_v20 = vld [vmem:[%s2725_s7 + $0x8] sm:$0xff]  }
 0x2bf   : > { %v2551_v21 = vpop.f32.mrf.mxu0 }
 0x2c1   : > { %v2038_v22 = vpop.f32.mrf.mxu0 }
 0x2c2   : > { %v1064_v4 = vadd.f32 %v2038_v22, %v908_v12 }
 0x2c3   : > { %v2553_v23 = vpop.f32.mrf.mxu0 }
 0x2c4   : > { %v1118_v18 = vmax.f32 %v1064_v4, 0.0  ;;  %v1056_v19 = vadd.f32 %v2553_v23, %v898_v17  ;;  %v2133_v23 = vld [vmem:[%s2725_s7 + $0x10] sm:$0xff]  }
 0x2c5   : > { %v2041_v25 = vpop.f32.mrf.mxu0 }
 0x2c6   : > { %v1077_v3 = vadd.f32 %v2041_v25, %v923_v56  ;;  %v893_v25 = vpop.permute.xlu0 %892  ;;  %v1116_v22 = vmax.f32 %v1056_v19, 0.0 }
 0x2c7   : > { %v1068_v27 = vpop.f32.mrf.mxu0 }
 0x2c8   : > { %v1121_v6 = vmax.f32 %v1077_v3, 0.0  ;;  %v1069_v13 = vadd.f32 %v1068_v27, %v913_v2  ;;  %v1053_v27 = vadd.f32 %v2551_v21, %v893_v25  ;;  %v2134_v21 = vld [vmem:[%s2725_s7 + $0x18] sm:$0xff]  }
 0x2c9   : > { %v2042_v28 = vpop.f32.mrf.mxu0 }
 0x2ca   : > { %v1080_v63 = vadd.f32 %v2042_v28, %v928_v51  ;;  %v1119_v16 = vmax.f32 %v1069_v13, 0.0 }
 0x2cb   : > { %v1071_v30 = vpop.f32.mrf.mxu0 }
 0x2cc   : > { %v1122_v9 = vmax.f32 %v1080_v63, 0.0  ;;  %v1072_v10 = vadd.f32 %v1071_v30, %v918_v62  ;;  %v2149_v62 = vld [vmem:[%s2727_s9 + $0x4] ss:$8 sps:$4 sm:$0xff]  }
 0x2cd   : > { %v2045_v32 = vpop.f32.mrf.mxu0  ;;  %1748 = vmatprep.mubr.bf16.mxu0 %v2149_v62 }
 0x2ce   : > { %v1093_v52 = vadd.f32 %v2045_v32, %v943_v36  ;;  %v1134_v7 = vpack.c.bf16 %v1122_v9, %v1121_v6  ;;  %v1120_v5 = vmax.f32 %v1072_v10, 0.0  ;;  %v2136_v32 = vld [vmem:[%s2725_s7 + $0x28] sm:$0xff]  }
 0x2cf   : > { %v1084_v33 = vpop.f32.mrf.mxu0  ;;  %v2140_v36 = vld [vmem:[%s2725_s7 + $0x48] sm:$0xff]  }
 0x2d0   : > { %v1125_v60 = vmax.f32 %v1093_v52, 0.0  ;;  %v1085_v61 = vadd.f32 %v1084_v33, %v933_v42  ;;  %v2137_v33 = vld [vmem:[%s2725_s7 + $0x30] sm:$0xff]   ;;  %v2146_v42 = vld [vmem:[%s2725_s7 + $0x78] sm:$0xff]  }
 0x2d1   : > { %v2046_v35 = vpop.f32.mrf.mxu0 }
 0x2d2   : > { %v1096_v47 = vadd.f32 %v2046_v35, %v948_v34  ;;  %v1123_v8 = vmax.f32 %v1085_v61, 0.0  ;;  %v2138_v34 = vld [vmem:[%s2725_s7 + $0x38] sm:$0xff]   ;;  %v2139_v35 = vld [vmem:[%s2725_s7 + $0x40] sm:$0xff]  }
 0x2d3   : > { %v1087_v37 = vpop.f32.mrf.mxu0 }
 0x2d4   : > { %v1126_v57 = vmax.f32 %v1096_v47, 0.0  ;;  %v1088_v58 = vadd.f32 %v1087_v37, %v938_v39  ;;  %v2141_v37 = vld [vmem:[%s2725_s7 + $0x50] sm:$0xff]   ;;  %v2143_v39 = vld [vmem:[%s2725_s7 + $0x60] sm:$0xff]  }
 0x2d5   : > { %v2049_v38 = vpop.f32.mrf.mxu0 }
 0x2d6   : > { %v1109_v41 = vadd.f32 %v2049_v38, %v963_v26  ;;  %v1136_v0 = vpack.c.bf16 %v1126_v57, %v1125_v60  ;;  %v1124_v1 = vmax.f32 %v1088_v58, 0.0  ;;  %v1117_v26 = vmax.f32 %v1061_v15, 0.0  ;;  %v2142_v38 = vld [vmem:[%s2725_s7 + $0x58] sm:$0xff]  }
 0x2d7   : > { %v1100_v40 = vpop.f32.mrf.mxu0 }
 0x2d8   : > { %v1101_v44 = vadd.f32 %v1100_v40, %v953_v31  ;;  %v1129_v48 = vmax.f32 %v1109_v41, 0.0  ;;  %v1135_v11 = vpack.c.bf16 %v1124_v1, %v1123_v8  ;;  %v1132_v28 = vpack.c.bf16 %v1118_v18, %v1117_v26  ;;  %v2135_v31 = vld [vmem:[%s2725_s7 + $0x20] sm:$0xff]   ;;  %v2144_v40 = vld [vmem:[%s2725_s7 + $0x68] sm:$0xff]   ;;  %v2145_v41 = vld [vmem:[%s2725_s7 + $0x70] sm:$0xff]  }
 0x2d9   : > { %v2050_v43 = vpop.f32.mrf.mxu0 }
 0x2da   : > { %v1112_v45 = vadd.f32 %v2050_v43, %v968_v24  ;;  %v1127_v53 = vmax.f32 %v1101_v44, 0.0  ;;  %v1133_v24 = vpack.c.bf16 %v1120_v5, %v1119_v16  ;;  %v2603_v43 = vpop.permute.xlu0 %1355  ;;  %v2605_v44 = vpop.permute.xlu1 %1360 }
 0x2db   : > { %v1103_v46 = vpop.f32.mrf.mxu0 }
 0x2dc   : > { %v1130_v49 = vmax.f32 %v1112_v45, 0.0  ;;  %v1104_v50 = vadd.f32 %v1103_v46, %v958_v29  ;;  %v1115_v29 = vmax.f32 %v1053_v27, 0.0 }
 0x2de   : > { %v1128_v54 = vmax.f32 %v1104_v50, 0.0  ;;  %v1138_v55 = vpack.c.bf16 %v1130_v49, %v1129_v48  ;;  %v1131_v30 = vpack.c.bf16 %v1116_v22, %v1115_v29  ;;  %v2607_v45 = vpop.permute.xlu0 %1275  ;;  %v2609_v46 = vpop.permute.xlu1 %1280 }
 0x2e0   : > { %v1137_v59 = vpack.c.bf16 %v1128_v54, %v1127_v53  ;;  %2051 = vmatprep.subr.bf16.mxu1 %v1138_v55 }
 0x2e1   : > { %2052 = vmatpush3.bf16.msra.mxu1 %v1138_v55 }
 0x2e2   : > { %2053 = vmatprep.subr.bf16.mxu1 %v1137_v59  ;;  %v2611_v47 = vpop.permute.xlu0 %1345  ;;  %v2613_v48 = vpop.permute.xlu1 %1350 }
 0x2e5   : > { %2054 = vmatpush3.bf16.msra.mxu1 %v1137_v59 }
 0x2e6   : > { %2055 = vmatprep.subr.bf16.mxu1 %v1136_v0  ;;  %v2615_v49 = vpop.permute.xlu0 %1265  ;;  %v2617_v50 = vpop.permute.xlu1 %1270 }
 0x2e9   : > { %2056 = vmatpush3.bf16.msra.mxu1 %v1136_v0 }
 0x2ea   : > { %2057 = vmatprep.subr.bf16.mxu1 %v1135_v11  ;;  %v2619_v51 = vpop.permute.xlu0 %1335  ;;  %v2621_v52 = vpop.permute.xlu1 %1340 }
 0x2ed   : > { %2058 = vmatpush3.bf16.msra.mxu1 %v1135_v11 }
 0x2ee   : > { %2059 = vmatprep.subr.bf16.mxu1 %v1134_v7  ;;  %v2623_v53 = vpop.permute.xlu0 %1255  ;;  %v2625_v54 = vpop.permute.xlu1 %1260 }
 0x2f1   : > { %2060 = vmatpush3.bf16.msra.mxu1 %v1134_v7 }
 0x2f2   : > { %2061 = vmatprep.subr.bf16.mxu1 %v1133_v24  ;;  %v2627_v55 = vpop.permute.xlu0 %1325  ;;  %v2629_v56 = vpop.permute.xlu1 %1330 }
 0x2f5   : > { %2062 = vmatpush3.bf16.msra.mxu1 %v1133_v24 }
 0x2f6   : > { %2063 = vmatprep.subr.bf16.mxu1 %v1132_v28  ;;  %v2631_v57 = vpop.permute.xlu0 %1245  ;;  %v2633_v58 = vpop.permute.xlu1 %1250 }
 0x2f9   : > { %2064 = vmatpush3.bf16.msra.mxu1 %v1132_v28 }
 0x2fa   : > { %2065 = vmatprep.subr.bf16.mxu1 %v1131_v30  ;;  %v2635_v59 = vpop.permute.xlu0 %1315  ;;  %v2637_v60 = vpop.permute.xlu1 %1320 }
 0x2fd   : > { %2066 = vmatpush3.bf16.msra.mxu1 %v1131_v30 }
 0x2fe   : > { %v1236_v61 = vpop.permute.xlu0 %1235  ;;  %v1241_v63 = vpop.permute.xlu1 %1240 }
 0x300   : > { %2068 = vmatmul.mubr.bf16.vlgmr.msra.gmra.mxu1 %v2132_v20 }
 0x301   : > { %2071 = vmatprep.mubr.bf16.mxu1 %v2133_v23 }
 0x302   : > { %v2642_v0 = vpop.permute.xlu0 %1305  ;;  %v2644_v1 = vpop.permute.xlu1 %1310 }
 0x306   : > { %v1226_v2 = vpop.permute.xlu0 %1225  ;;  %v1231_v3 = vpop.permute.xlu1 %1230 }
 0x308   : > { %2072 = vmatmul.mubr.bf16.gmra.mxu1 %v2134_v21 }
 0x309   : > { %2075 = vmatprep.mubr.bf16.mxu1 %v2135_v31 }
 0x30a   : > { %v2646_v8 = vpop.permute.xlu0 %1295  ;;  %v2648_v9 = vpop.permute.xlu1 %1300 }
 0x30e   : > { %v1216_v10 = vpop.permute.xlu0 %1215  ;;  %v1221_v11 = vpop.permute.xlu1 %1220 }
 0x310   : > { %2076 = vmatmul.mubr.bf16.gmra.mxu1 %v2136_v32 }
 0x311   : > { %2079 = vmatprep.mubr.bf16.mxu1 %v2137_v33 }
 0x312   : > { %v2650_v12 = vpop.permute.xlu0 %1285  ;;  %v2652_v6 = vpop.permute.xlu1 %1290 }
 0x316   : > { %v1206_v7 = vpop.permute.xlu0 %1205  ;;  %v1211_v17 = vpop.permute.xlu1 %1210 }
 0x318   : > { %2080 = vmatmul.mubr.bf16.gmra.mxu1 %v2138_v34 }
 0x319   : > { %2083 = vmatprep.mubr.bf16.mxu1 %v2139_v35 }
 0x320   : > { %2084 = vmatmul.mubr.bf16.gmra.mxu1 %v2140_v36 }
 0x321   : > { %2087 = vmatprep.mubr.bf16.mxu1 %v2141_v37 }
 0x328   : > { %2088 = vmatmul.mubr.bf16.gmra.mxu1 %v2142_v38 }
 0x329   : > { %2091 = vmatprep.mubr.bf16.mxu1 %v2143_v39 }
 0x330   : > { %2092 = vmatmul.mubr.bf16.gmra.mxu1 %v2144_v40 }
 0x331   : > { %2095 = vmatprep.mubr.bf16.mxu1 %v2145_v41 }
 0x338   : > { %2096 = vmatmul.mubr.bf16.gmra.mxu1 %v2146_v42 }
 0x3c0   : > { %v2069_v13 = vpop.f32.mrf.mxu1 }
 0x3c1   : > { %v1502_v4 = vadd.f32 %v2069_v13, %v1216_v10 }
 0x3c2   : > { %v1493_v14 = vpop.f32.mrf.mxu1 }
 0x3c3   : > { %v1494_v15 = vadd.f32 %v1493_v14, %v1206_v7  ;;  %v1622_v19 = vmax.f32 %v1502_v4, 0.0 }
 0x3c4   : > { %v2070_v5 = vpop.f32.mrf.mxu1 }
 0x3c5   : > { %v1505_v16 = vadd.f32 %v2070_v5, %v1221_v11  ;;  %v1620_v27 = vmax.f32 %v1494_v15, 0.0 }
 0x3c6   : > { %v1496_v18 = vpop.f32.mrf.mxu1 }
 0x3c7   : > { %v1623_v24 = vmax.f32 %v1505_v16, 0.0  ;;  %v1497_v25 = vadd.f32 %v1496_v18, %v1211_v17 }
 0x3c8   : > { %v2073_v26 = vpop.f32.mrf.mxu1 }
 0x3c9   : > { %v2654_v28 = vpack.c.bf16 %v1623_v24, %v1622_v19  ;;  %v1621_v22 = vmax.f32 %v1497_v25, 0.0  ;;  %v1518_v20 = vadd.f32 %v2073_v26, %v1236_v61 }
 0x3ca   : > { %v1509_v29 = vpop.f32.mrf.mxu1 }
 0x3cb   : > { %v2656_v30 = vpack.c.bf16 %v1621_v22, %v1620_v27  ;;  %v1510_v21 = vadd.f32 %v1509_v29, %v1226_v2  ;;  %v1626_v33 = vmax.f32 %v1518_v20, 0.0 }
 0x3cc   : > { %v2074_v23 = vpop.f32.mrf.mxu1 }
 0x3cd   : > { %v1521_v31 = vadd.f32 %v2074_v23, %v1241_v63  ;;  %v1624_v37 = vmax.f32 %v1510_v21, 0.0 }
 0x3ce   : > { %v1512_v32 = vpop.f32.mrf.mxu1 }
 0x3cf   : > { %v1627_v34 = vmax.f32 %v1521_v31, 0.0  ;;  %v1513_v35 = vadd.f32 %v1512_v32, %v1231_v3 }
 0x3d0   : > { %v2077_v36 = vpop.f32.mrf.mxu1 }
 0x3d1   : > { %v2658_v38 = vpack.c.bf16 %v1627_v34, %v1626_v33  ;;  %v1625_v39 = vmax.f32 %v1513_v35, 0.0 }
 0x3d2   : > { %v1525_v40 = vpop.f32.mrf.mxu1 }
 0x3d3   : > { %v2660_v41 = vpack.c.bf16 %v1625_v39, %v1624_v37 }
 0x3d4   : > { %v2078_v42 = vpop.f32.mrf.mxu1 }
 0x3d6   : > { %v1528_v62 = vpop.f32.mrf.mxu1 }
 0x3d8   : > { %v2081_v10 = vpop.f32.mrf.mxu1 }
 0x3d9   : > { %v1550_v22 = vadd.f32 %v2081_v10, %v2607_v45 }
 0x3da   : > { %v1541_v11 = vpop.f32.mrf.mxu1 }
 0x3db   : > { %v1634_v37 = vmax.f32 %v1550_v22, 0.0 }
 0x3dc   : > { %v2082_v61 = vpop.f32.mrf.mxu1 }
 0x3dd   : > { %v1553_v25 = vadd.f32 %v2082_v61, %v2609_v46 }
 0x3de   : > { %v1544_v13 = vpop.f32.mrf.mxu1 }
 0x3df   : > { %v1635_v21 = vmax.f32 %v1553_v25, 0.0  ;;  %v1545_v31 = vadd.f32 %v1544_v13, %v2617_v50 }
 0x3e0   : > { %v2662_v2 = vpop.f32.mrf.mxu1 }
 0x3e1   : > { %v1659_v61 = vpack.c.bf16 %v1635_v21, %v1634_v37 }
 0x3e2   : > { %v2664_v63 = vpop.f32.mrf.mxu1 }
 0x3e4   : > { %v2666_v14 = vpop.f32.mrf.mxu1 }
 0x3e6   : > { %v2668_v3 = vpop.f32.mrf.mxu1 }
 0x3e8   : > { %v2089_v4 = vpop.f32.mrf.mxu1 }
 0x3ea   : > { %v1573_v7 = vpop.f32.mrf.mxu1 }
 0x3ec   : > { %v2090_v5 = vpop.f32.mrf.mxu1 }
 0x3ee   : > { %v1576_v15 = vpop.f32.mrf.mxu1 }
 0x3f0   : > { %v2093_v16 = vpop.f32.mrf.mxu1 }
 0x3f1   : > { %v1598_v45 = vadd.f32 %v2093_v16, %v2619_v51 }
 0x3f2   : > { %v1589_v17 = vpop.f32.mrf.mxu1 }
 0x3f3   : > { %v1646_v25 = vmax.f32 %v1598_v45, 0.0 }
 0x3f4   : > { %v2094_v18 = vpop.f32.mrf.mxu1 }
 0x3f5   : > { %v1601_v33 = vadd.f32 %v2094_v18, %v2621_v52  ;;  %v1534_v18 = vadd.f32 %v2077_v36, %v2623_v53  ;;  %v1582_v53 = vadd.f32 %v2089_v4, %v2635_v59  ;;  %v1566_v4 = vadd.f32 %v2662_v2, %v2646_v8 }
 0x3f6   : > { %v1592_v19 = vpop.f32.mrf.mxu1 }
 0x3f7   : > { %v1647_v50 = vmax.f32 %v1601_v33, 0.0  ;;  %v1593_v13 = vadd.f32 %v1592_v19, %v2629_v56  ;;  %v1526_v56 = vadd.f32 %v1525_v40, %v2631_v57  ;;  %v1569_v57 = vadd.f32 %v2666_v14, %v2648_v9 }
 0x3f8   : > { %v2097_v24 = vpop.f32.mrf.mxu1 }
 0x3f9   : > { %v1614_v27 = vadd.f32 %v2097_v24, %v2603_v43  ;;  %v1542_v43 = vadd.f32 %v1541_v11, %v2615_v49  ;;  %v1633_v24 = vmax.f32 %v1545_v31, 0.0  ;;  %v1590_v49 = vadd.f32 %v1589_v17, %v2627_v55 }
 0x3fa   : > { %v1605_v26 = vpop.f32.mrf.mxu1  ;;  %v1529_v11 = vadd.f32 %v1528_v62, %v2633_v58  ;;  %v1577_v17 = vadd.f32 %v1576_v15, %v2644_v1  ;;  %v1628_v58 = vmax.f32 %v1526_v56, 0.0  ;;  %v1642_v62 = vmax.f32 %v1582_v53, 0.0 }
 0x3fb   : > { %v1606_v20 = vadd.f32 %v1605_v26, %v2611_v47  ;;  %v1650_v34 = vmax.f32 %v1614_v27, 0.0  ;;  %v1645_v26 = vmax.f32 %v1593_v13, 0.0  ;;  %v1630_v27 = vmax.f32 %v1534_v18, 0.0 }
 0x3fc   : > { %v2098_v29 = vpop.f32.mrf.mxu1  ;;  %v1644_v36 = vmax.f32 %v1590_v49, 0.0  ;;  %v1629_v22 = vmax.f32 %v1529_v11, 0.0  ;;  %v1641_v59 = vmax.f32 %v1577_v17, 0.0  ;;  %v1639_v1 = vmax.f32 %v1569_v57, 0.0 }
 0x3fd   : > { %v1617_v23 = vadd.f32 %v2098_v29, %v2605_v44  ;;  %v1648_v39 = vmax.f32 %v1606_v20, 0.0  ;;  %v1537_v44 = vadd.f32 %v2078_v42, %v2625_v54  ;;  %v1585_v54 = vadd.f32 %v2090_v5, %v2637_v60 }
 0x3fe   : > { %v1608_v32 = vpop.f32.mrf.mxu1  ;;  %v1665_v42 = vpack.c.bf16 %v1647_v50, %v1646_v25  ;;  %v1664_v29 = vpack.c.bf16 %v1645_v26, %v1644_v36  ;;  %v1574_v60 = vadd.f32 %v1573_v7, %v2642_v0  ;;  %v1656_v5 = vpack.c.bf16 %v1629_v22, %v1628_v58 }
 0x3ff   : > { %v1651_v35 = vmax.f32 %v1617_v23, 0.0  ;;  %v1609_v46 = vadd.f32 %v1608_v32, %v2613_v48  ;;  %v1632_v48 = vmax.f32 %v1542_v43, 0.0  ;;  %v1631_v51 = vmax.f32 %v1537_v44, 0.0 }
 0x400   : > { %v1643_v55 = vmax.f32 %v1585_v54, 0.0  ;;  %v1640_v20 = vmax.f32 %v1574_v60, 0.0  ;;  %v1561_v15 = vadd.f32 %v2668_v3, %v2652_v6  ;;  %v1638_v0 = vmax.f32 %v1566_v4, 0.0  ;;  %v2147_v6 = vld [vmem:[%s2727_s9] ss:$8 sps:$4 sm:$0xff]  }
 0x401   : > { %v1667_v10 = vpack.c.bf16 %v1651_v35, %v1650_v34  ;;  %v1649_v47 = vmax.f32 %v1609_v46, 0.0  ;;  %v1658_v16 = vpack.c.bf16 %v1633_v24, %v1632_v48  ;;  %v1657_v19 = vpack.c.bf16 %v1631_v51, %v1630_v27  ;;  %v1684_v34 = vpop.permute.xlu1 %1683 }
 0x402   : > { %v1663_v40 = vpack.c.bf16 %v1643_v55, %v1642_v62  ;;  %v1662_v23 = vpack.c.bf16 %v1641_v59, %v1640_v20  ;;  %v1558_v7 = vadd.f32 %v2664_v63, %v2650_v12  ;;  %v1661_v9 = vpack.c.bf16 %v1639_v1, %v1638_v0  ;;  %v2150_v12 = vld [vmem:[%s2727_s9 + $0x14] ss:$8 sps:$4 sm:$0xff]   ;;  %v1679_v63 = vpop.permute.xlu0 %1678 }
 0x403   : > { %v1666_v52 = vpack.c.bf16 %v1649_v47, %v1648_v39  ;;  %1957 = vmatprep.subr.bf16.mxu0 %v1667_v10  ;;  %v1637_v14 = vmax.f32 %v1561_v15, 0.0 }
 0x404   : > { %1958 = vmatpush3.bf16.msra.mxu0 %v1659_v61  ;;  %v1636_v21 = vmax.f32 %v1558_v7, 0.0 }
 0x405   : > { %1959 = vmatprep.subr.bf16.mxu0 %v1666_v52  ;;  %v1694_v50 = vpop.permute.xlu1 %1693 }
 0x406   : > { %v1660_v8 = vpack.c.bf16 %v1637_v14, %v1636_v21  ;;  %v1689_v39 = vpop.permute.xlu0 %1688 }
 0x408   : > { %1960 = vmatpush3.bf16.msra.mxu0 %v1658_v16 }
 0x409   : > { %1961 = vmatprep.subr.bf16.mxu0 %v1665_v42 }
 0x40c   : > { %1962 = vmatpush3.bf16.msra.mxu0 %v1657_v19 }
 0x40d   : > { %1963 = vmatprep.subr.bf16.mxu0 %v1664_v29 }
 0x410   : > { %1964 = vmatpush3.bf16.msra.mxu0 %v1656_v5 }
 0x411   : > { %1965 = vmatprep.subr.bf16.mxu0 %v1663_v40 }
 0x414   : > { %1966 = vmatpush3.bf16.msra.mxu0 %v2658_v38  ;;  %v2152_v38 = vld [vmem:[%s2727_s9 + $0x10] ss:$8 sps:$4 sm:$0xff]  }
 0x415   : > { %1967 = vmatprep.subr.bf16.mxu0 %v1662_v23 }
 0x418   : > { %1968 = vmatpush3.bf16.msra.mxu0 %v2660_v41 }
 0x419   : > { %1969 = vmatprep.subr.bf16.mxu0 %v1661_v9 }
 0x41c   : > { %1970 = vmatpush3.bf16.msra.mxu0 %v2654_v28 }
 0x41d   : > { %1971 = vmatprep.subr.bf16.mxu0 %v1660_v8 }
 0x420   : > { %1972 = vmatpush3.bf16.msra.mxu0 %v2656_v30 }
 0x423   : > { %1749 = vmatmul.mubr.bf16.vlgmr.msra.gmra.mxu0 %v2147_v6 }
 0x424   : > { %1756 = vmatprep.mubr.bf16.mxu0 %v2150_v12 }
 0x42b   : > { %1757 = vmatmul.mubr.bf16.gmra.mxu0 %v2152_v38 }
 0x4e3   : > { %v1973_v41 = vpop.f32.mrf.mxu0 }
 0x4e5   : > { %v1974_v28 = vpop.f32.mrf.mxu0 }
 0x4e6   : > { %v1975_v2 = vadd.f32 %v1974_v28, %v1973_v41 }
 0x4e7   : > { %v1976_v3 = vpop.f32.mrf.mxu0 }
 0x4e8   : > { %v1751_v31 = vadd.f32 %v1975_v2, %v1679_v63 }
 0x4e9   : > { %v1977_v32 = vpop.f32.mrf.mxu0 }
 0x4ea   : > { %v1978_v33 = vadd.f32 %v1977_v32, %v1976_v3  ;;  %v1765_v30 = vmax.f32 %v1751_v31, 0.0 }
 0x4eb   : > { %v1979_v35 = vpop.f32.mrf.mxu0 }
 0x4ec   : > { %1769 = vmax.xlane.f32.xlu0 %v1765_v30  ;;  %v1754_v46 = vadd.f32 %v1978_v33, %v1684_v34 }
 0x4ed   : > { %v1980_v37 = vpop.f32.mrf.mxu0 }
 0x4ee   : > { %v1981_v43 = vadd.f32 %v1980_v37, %v1979_v35  ;;  %v1766_v45 = vmax.f32 %v1754_v46, 0.0 }
 0x4ef   : > { %v1982_v10 = vpop.f32.mrf.mxu0 }
 0x4f0   : > { %1771 = vmax.xlane.f32.xlu1 %v1766_v45  ;;  %v1759_v47 = vadd.f32 %v1981_v43, %v1689_v39 }
 0x4f1   : > { %v1983_v44 = vpop.f32.mrf.mxu0 }
 0x4f2   : > { %v1984_v61 = vadd.f32 %v1983_v44, %v1982_v10  ;;  %v1767_v24 = vmax.f32 %v1759_v47, 0.0 }
 0x4f4   : > { %1773 = vmax.xlane.f32.xlu0 %v1767_v24  ;;  %v1762_v13 = vadd.f32 %v1984_v61, %v1694_v50 }
 0x4f6   : > { %v1768_v52 = vmax.f32 %v1762_v13, 0.0 }
 0x4f8   : > { %1775 = vmax.xlane.f32.xlu0 %v1768_v52 }
 0x575   : > { %v1770_v18 = vpop.xlane.xlu0 %1769 }
 0x576   : > { %1778 = vst.msk [vmem:[%s383_s20] sm:$0xff] %vm1777_vm4, %v1770_v18 }
 0x579   : > { %v1772_v48 = vpop.xlane.xlu1 %1771 }
 0x57a   : > { %1779 = vst.msk [vmem:[%s383_s20 + $0x8] sm:$0xff] %vm1777_vm4, %v1772_v48 }
 0x57d   : > { %v1774_v25 = vpop.xlane.xlu0 %1773 }
 0x57e   : > { %1780 = vst.msk [vmem:[%s383_s20 + $0x10] sm:$0xff] %vm1777_vm4, %v1774_v25 }
 0x581   : > { %v1776_v49 = vpop.xlane.xlu0 %1775 }
 0x582   : > { %1781 = vst.msk [vmem:[%s383_s20 + $0x18] sm:$0xff] %vm1777_vm4, %v1776_v49 }
 0x583 PF: > { %s21_s17 = sadd.s32 1, %s2159_s17  }
 0x584   : > { %p18_p4 = scmp.ge.s32.totalorder %s21_s17, 4  }
 0x586   :  { %20 = sbr.rel (!%p18_p4) target bundleno = 1 (0x1), region = 94 }

</bundles_post_ra>
